<compile_context>
chip_gen: v7x
topology: tpu7x:2x2x1
jax: 0.10.0
libtpu: 0.0.40
codegen_flags: <defaults>
</compile_context>

<pallas_src>
import jax
import jax.numpy as jnp
import numpy as np
from jax.experimental import pallas as pl
from jax.experimental.pallas import tpu as pltpu


# ----------------------------- config ---------------------------------------
class Config:
    n_patches = 16
    hidden_dim = 32
    tokens_mlp_dim = 24
    hidden_shape = (4, 8)          # prod == hidden_dim
    channels_mlp_shape = (8, 8)    # prod == channels_mlp_dim (ff dim) == 64
    tt_ranks = (1, 2, 1)


# ------------------------- kernel helpers (traced) ---------------------------
def _layernorm(x, gamma, beta, eps=1e-6):
    # The module explicitly uses nn.LayerNorm(..., eps=1e-06).
    mean = jnp.mean(x, axis=-1, keepdims=True)
    var = jnp.mean((x - mean) ** 2, axis=-1, keepdims=True)
    inv = jax.lax.rsqrt(var + eps)
    return (x - mean) * inv * gamma + beta


def _erf(x):
    # Abramowitz & Stegun 7.1.26, |error| <= 1.5e-7. Only exp / mul / add /
    # where / abs — all guaranteed Mosaic lowerings; exp uses the EUP slot.
    p = 0.3275911
    a1, a2, a3, a4, a5 = (0.254829592, -0.284496736, 1.421413741,
                          -1.453152027, 1.061405429)
    ax = jnp.abs(x)
    t = 1.0 / (1.0 + p * ax)
    poly = t * (a1 + t * (a2 + t * (a3 + t * (a4 + t * a5))))
    y = 1.0 - poly * jnp.exp(-ax * ax)
    return jnp.where(x >= 0, y, -y)


def _gelu(x):
    # Exact (erf-based) GELU — matches PyTorch nn.GELU() default to ~1e-7.
    return 0.5 * x * (1.0 + _erf(x * 0.7071067811865476))


# ------------------------------- kernel --------------------------------------
def tt_mixer_kernel(
    x_ref,                                   # (BB*P, D)   f32
    pre_g_ref, pre_b_ref,                    # (1, D)      f32
    tw0_ref, tb0_ref, tw1_ref, tb1_ref,      # (T,P) bf16, (T,1) f32, (P,T) bf16, (P,1) f32
    post_g_ref, post_b_ref,                  # (1, D)      f32
    cw0_ref, cb0_ref, cw1_ref, cb1_ref,      # (D,FF) bf16, (1,FF) f32, (FF,D) bf16, (1,D) f32
    o_ref,                                   # (BB*P, D)   f32
):
    f32 = jnp.float32
    bf16 = jnp.bfloat16
    P = tw0_ref.shape[1]
    BB = x_ref.shape[0] // P                 # batches in this shard (static)

    x = x_ref[...].astype(f32)               # (BB*P, D)

    # ---------------- token-mixing branch (no transposes) --------------------
    y = _layernorm(x, pre_g_ref[...], pre_b_ref[...])          # pre_norm over D
    tw0 = tw0_ref[...]                        # (T, P) bf16
    tw1 = tw1_ref[...]                        # (P, T) bf16
    tb0 = tb0_ref[...]                        # (T, 1) f32 - broadcasts along lanes (D)
    tb1 = tb1_ref[...]                        # (P, 1) f32
    tok_parts = []
    for b in range(BB):                       # static loop; BB == 1 in the test config
        yb = y[b * P:(b + 1) * P, :].astype(bf16)                          # (P, D)
        u = jnp.dot(tw0, yb, preferred_element_type=f32) + tb0             # (T, D)
        u = _gelu(u).astype(bf16)
        v = jnp.dot(tw1, u, preferred_element_type=f32) + tb1              # (P, D)
        tok_parts.append(v)
    tok = tok_parts[0] if BB == 1 else jnp.concatenate(tok_parts, axis=0)  # (BB*P, D)
    x = x + tok                               # residual

    # ---------------- channel (TT) mixing branch (batched along M) -----------
    y = _layernorm(x, post_g_ref[...], post_b_ref[...]).astype(bf16)       # (BB*P, D)
    z = jnp.dot(y, cw0_ref[...], preferred_element_type=f32) + cb0_ref[...]  # (BB*P, FF)
    z = _gelu(z).astype(bf16)
    z = jnp.dot(z, cw1_ref[...], preferred_element_type=f32) + cb1_ref[...]  # (BB*P, D)
    x = x + z                                 # residual

    o_ref[...] = x.astype(o_ref.dtype)


# ------------------------------ wrapper ---------------------------------------
def tt_mixer_block(x, params, *, num_shards=2):
    """Fused TTMixerBlock forward. x: (B, P, D) float32."""
    B, P, D = x.shape
    T = params["tw0"].shape[0]
    FF = params["cw0"].shape[1]

    # At most 2 batch shards (one per v7x TensorCore); degrade to 1 shard otherwise.
    NS = num_shards if (B >= num_shards and B % num_shards == 0) else 1
    BB = B // NS

    x2d = x.reshape(B * P, D)                 # free metadata reshape in XLA

    rep = lambda shape: pl.BlockSpec(shape, lambda s: tuple(0 for _ in shape))

    out2d = pl.pallas_call(
        tt_mixer_kernel,
        out_shape=jax.ShapeDtypeStruct((B * P, D), x.dtype),
        grid=(NS,),
        in_specs=[
            pl.BlockSpec((BB * P, D), lambda s: (s, 0)),       # activation slab
            rep((1, D)), rep((1, D)),                          # pre_norm gamma / beta
            rep((T, P)), rep((T, 1)),                          # token fc0: W (T,P), b as column
            rep((P, T)), rep((P, 1)),                          # token fc1: W (P,T), b as column
            rep((1, D)), rep((1, D)),                          # post_norm gamma / beta
            rep((D, FF)), rep((1, FF)),                        # channel TT fc0 (dense W, b)
            rep((FF, D)), rep((1, D)),                         # channel TT fc1 (dense W, b)
        ],
        out_specs=pl.BlockSpec((BB * P, D), lambda s: (s, 0)),
        compiler_params=pltpu.CompilerParams(
            dimension_semantics=("parallel",)),
    )(
        x2d,
        params["pre_g"], params["pre_b"],
        params["tw0"], params["tb0"], params["tw1"], params["tb1"],
        params["post_g"], params["post_b"],
        params["cw0"], params["cb0"], params["cw1"], params["cb1"],
    )
    return out2d.reshape(B, P, D)


# ----------------------- parameter construction (glue) ------------------------
def tt_cores_to_full(cores, in_shape, out_shape):
    """cores[k]: (r_k, in_k, out_k, r_{k+1}) -> full (prod(in), prod(out))."""
    res = cores[0][0]                                       # (i0, o0, r1)
    I, O = in_shape[0], out_shape[0]
    for core in cores[1:]:
        res = jnp.einsum("IOr,rios->IiOos", res, core)
        I *= core.shape[1]
        O *= core.shape[2]
        res = res.reshape(I, O, core.shape[3])
    return res.reshape(I, O)


def make_params(cfg, key):
    P, D, T = cfg.n_patches, cfg.hidden_dim, cfg.tokens_mlp_dim
    in_sh, out_sh, ranks = cfg.hidden_shape, cfg.channels_mlp_shape, cfg.tt_ranks
    FF = int(np.prod(out_sh))
    ks = list(jax.random.split(key, 16))
    nrm = lambda k, shape, s=0.05: (s * jax.random.normal(k, shape)).astype(jnp.float32)
    bf16 = jnp.bfloat16

    params = {
        # LayerNorms (f32)
        "pre_g": 1.0 + nrm(ks[0], (1, D)), "pre_b": nrm(ks[1], (1, D)),
        "post_g": 1.0 + nrm(ks[2], (1, D)), "post_b": nrm(ks[3], (1, D)),
        # token MLP in PyTorch layout: W0 (T,P), W1 (P,T); biases stored as columns
        # so they broadcast along the lane (D) axis inside the kernel. Weights bf16.
        "tw0": nrm(ks[4], (T, P)).astype(bf16), "tb0": nrm(ks[5], (T, 1)),
        "tw1": nrm(ks[6], (P, T)).astype(bf16), "tb1": nrm(ks[7], (P, 1)),
    }

    # channel TT MLP: TTLinear(hidden_shape -> channels_mlp_shape) and back.
    cores0 = [nrm(ks[8 + k], (ranks[k], in_sh[k], out_sh[k], ranks[k + 1]), 0.2)
              for k in range(len(in_sh))]
    cores1 = [nrm(ks[10 + k], (ranks[k], out_sh[k], in_sh[k], ranks[k + 1]), 0.2)
              for k in range(len(in_sh))]
    params["cw0"] = tt_cores_to_full(cores0, in_sh, out_sh).astype(bf16)   # (D, FF)
    params["cb0"] = nrm(ks[12], (1, FF))
    params["cw1"] = tt_cores_to_full(cores1, out_sh, in_sh).astype(bf16)   # (FF, D)
    params["cb1"] = nrm(ks[13], (1, D))
    return params


# ---------------------------- pure-JAX reference -------------------------------
def ref_forward(x, p):
    f32 = jnp.float32
    bf16 = jnp.bfloat16

    def ln(v, g, b):
        m = jnp.mean(v, -1, keepdims=True)
        var = jnp.mean((v - m) ** 2, -1, keepdims=True)
        return (v - m) * jax.lax.rsqrt(var + 1e-6) * g[0] + b[0]

    def mm(a, w):
        # bf16 operands, f32 accumulation — same MXU numerics as the kernel.
        # (Deviates from PyTorch's pure-f32 matmuls by ~1e-3; deliberate.)
        return jnp.dot(a.astype(bf16), w.astype(bf16), preferred_element_type=f32)

    gelu = lambda v: jax.nn.gelu(v, approximate=False)   # true erf outside the kernel

    h = x
    y = ln(x, p["pre_g"], p["pre_b"])
    yt = jnp.swapaxes(y, -1, -2)                                  # (B, D, P)
    u = mm(yt, p["tw0"].T) + p["tb0"][:, 0]                       # (B, D, T)
    u = gelu(u)
    v = mm(u, p["tw1"].T) + p["tb1"][:, 0]                        # (B, D, P)
    x = jnp.swapaxes(v, -1, -2) + h
    h = x
    y = ln(x, p["post_g"], p["post_b"])
    z = gelu(mm(y, p["cw0"]) + p["cb0"][0])
    z = mm(z, p["cw1"]) + p["cb1"][0]
    return z + h


# --------------------------------- main ----------------------------------------
if __name__ == "__main__":
    cfg = Config()
    key = jax.random.PRNGKey(0)
    kx, kp = jax.random.split(key)

    x = jax.random.normal(kx, (2, cfg.n_patches, cfg.hidden_dim), dtype=jnp.float32)
    params = make_params(cfg, kp)

    out = tt_mixer_block(x, params)
    out = jax.block_until_ready(out)

    ref = ref_forward(x, params)
    np.testing.assert_allclose(np.asarray(out), np.asarray(ref), rtol=2e-3, atol=2e-3)

    print("KERNEL_OK")
</pallas_src>

<mosaic_0001>
module attributes {stable_mosaic.version = 11 : i64} {
  func.func @tt_mixer_kernel(%arg0: i32, %arg1: memref<16x32xf32, #tpu.memory_space<vmem>>, %arg2: memref<1x32xf32, #tpu.memory_space<vmem>>, %arg3: memref<1x32xf32, #tpu.memory_space<vmem>>, %arg4: memref<24x16xbf16, #tpu.memory_space<vmem>>, %arg5: memref<24x1xf32, #tpu.memory_space<vmem>>, %arg6: memref<16x24xbf16, #tpu.memory_space<vmem>>, %arg7: memref<16x1xf32, #tpu.memory_space<vmem>>, %arg8: memref<1x32xf32, #tpu.memory_space<vmem>>, %arg9: memref<1x32xf32, #tpu.memory_space<vmem>>, %arg10: memref<32x64xbf16, #tpu.memory_space<vmem>>, %arg11: memref<1x64xf32, #tpu.memory_space<vmem>>, %arg12: memref<64x32xbf16, #tpu.memory_space<vmem>>, %arg13: memref<1x32xf32, #tpu.memory_space<vmem>>, %arg14: memref<16x32xf32, #tpu.memory_space<vmem>>) attributes {dimension_semantics = [#tpu.dimension_semantics<parallel>], iteration_bounds = array<i64: 2>, scalar_prefetch = 0 : i64, scratch_operands = 0 : i64, tpu.core_type = #tpu.core_type<tc>, window_params = [{transform_indices = @transform_0, window_bounds = array<i64: 16, 32>}, {pipeline_mode = #tpu.pipeline_mode<synchronous>, transform_indices = @transform_1, window_bounds = array<i64: 1, 32>}, {pipeline_mode = #tpu.pipeline_mode<synchronous>, transform_indices = @transform_2, window_bounds = array<i64: 1, 32>}, {pipeline_mode = #tpu.pipeline_mode<synchronous>, transform_indices = @transform_3, window_bounds = array<i64: 24, 16>}, {pipeline_mode = #tpu.pipeline_mode<synchronous>, transform_indices = @transform_4, window_bounds = array<i64: 24, 1>}, {pipeline_mode = #tpu.pipeline_mode<synchronous>, transform_indices = @transform_5, window_bounds = array<i64: 16, 24>}, {pipeline_mode = #tpu.pipeline_mode<synchronous>, transform_indices = @transform_6, window_bounds = array<i64: 16, 1>}, {pipeline_mode = #tpu.pipeline_mode<synchronous>, transform_indices = @transform_7, window_bounds = array<i64: 1, 32>}, {pipeline_mode = #tpu.pipeline_mode<synchronous>, transform_indices = @transform_8, window_bounds = array<i64: 1, 32>}, {pipeline_mode = #tpu.pipeline_mode<synchronous>, transform_indices = @transform_9, window_bounds = array<i64: 32, 64>}, {pipeline_mode = #tpu.pipeline_mode<synchronous>, transform_indices = @transform_10, window_bounds = array<i64: 1, 64>}, {pipeline_mode = #tpu.pipeline_mode<synchronous>, transform_indices = @transform_11, window_bounds = array<i64: 64, 32>}, {pipeline_mode = #tpu.pipeline_mode<synchronous>, transform_indices = @transform_12, window_bounds = array<i64: 1, 32>}, {transform_indices = @transform_13, window_bounds = array<i64: 16, 32>}]} {
    %c0 = arith.constant 0 : index
    %c0_0 = arith.constant 0 : index
    %0 = vector.load %arg1[%c0, %c0_0] : memref<16x32xf32, #tpu.memory_space<vmem>>, vector<16x32xf32>
    %c0_1 = arith.constant 0 : index
    %c0_2 = arith.constant 0 : index
    %1 = vector.load %arg2[%c0_1, %c0_2] : memref<1x32xf32, #tpu.memory_space<vmem>>, vector<1x32xf32>
    %c0_3 = arith.constant 0 : index
    %c0_4 = arith.constant 0 : index
    %2 = vector.load %arg3[%c0_3, %c0_4] : memref<1x32xf32, #tpu.memory_space<vmem>>, vector<1x32xf32>
    %cst = arith.constant dense<0.000000e+00> : vector<16xf32>
    %3 = vector.multi_reduction <add>, %0, %cst [1] : vector<16x32xf32> to vector<16xf32>
    %4 = vector.shape_cast %3 : vector<16xf32> to vector<16x1xf32>
    %cst_5 = arith.constant 3.200000e+01 : f32
    %5 = vector.broadcast %cst_5 : f32 to vector<16x1xf32>
    %6 = arith.divf %4, %5 : vector<16x1xf32>
    %7 = vector.broadcast %6 : vector<16x1xf32> to vector<16x32xf32>
    %8 = arith.subf %0, %7 : vector<16x32xf32>
    %9 = arith.mulf %8, %8 : vector<16x32xf32>
    %cst_6 = arith.constant dense<0.000000e+00> : vector<16xf32>
    %10 = vector.multi_reduction <add>, %9, %cst_6 [1] : vector<16x32xf32> to vector<16xf32>
    %11 = vector.shape_cast %10 : vector<16xf32> to vector<16x1xf32>
    %cst_7 = arith.constant 3.200000e+01 : f32
    %12 = vector.broadcast %cst_7 : f32 to vector<16x1xf32>
    %13 = arith.divf %11, %12 : vector<16x1xf32>
    %cst_8 = arith.constant 9.99999997E-7 : f32
    %14 = vector.broadcast %cst_8 : f32 to vector<16x1xf32>
    %15 = arith.addf %13, %14 : vector<16x1xf32>
    %16 = math.rsqrt %15 : vector<16x1xf32>
    %17 = vector.broadcast %6 : vector<16x1xf32> to vector<16x32xf32>
    %18 = arith.subf %0, %17 : vector<16x32xf32>
    %19 = vector.broadcast %16 : vector<16x1xf32> to vector<16x32xf32>
    %20 = arith.mulf %18, %19 : vector<16x32xf32>
    %21 = vector.broadcast %1 : vector<1x32xf32> to vector<16x32xf32>
    %22 = arith.mulf %20, %21 : vector<16x32xf32>
    %23 = vector.broadcast %2 : vector<1x32xf32> to vector<16x32xf32>
    %24 = arith.addf %22, %23 : vector<16x32xf32>
    %c0_9 = arith.constant 0 : index
    %c0_10 = arith.constant 0 : index
    %25 = vector.load %arg4[%c0_9, %c0_10] : memref<24x16xbf16, #tpu.memory_space<vmem>>, vector<24x16xbf16>
    %c0_11 = arith.constant 0 : index
    %c0_12 = arith.constant 0 : index
    %26 = vector.load %arg6[%c0_11, %c0_12] : memref<16x24xbf16, #tpu.memory_space<vmem>>, vector<16x24xbf16>
    %c0_13 = arith.constant 0 : index
    %c0_14 = arith.constant 0 : index
    %27 = vector.load %arg5[%c0_13, %c0_14] : memref<24x1xf32, #tpu.memory_space<vmem>>, vector<24x1xf32>
    %c0_15 = arith.constant 0 : index
    %c0_16 = arith.constant 0 : index
    %28 = vector.load %arg7[%c0_15, %c0_16] : memref<16x1xf32, #tpu.memory_space<vmem>>, vector<16x1xf32>
    %29 = arith.truncf %24 : vector<16x32xf32> to vector<16x32xbf16>
    %cst_17 = arith.constant dense<0.000000e+00> : vector<24x32xf32>
    %30 = tpu.matmul %25, %29, %cst_17 {dimension_numbers = #tpu.dot_dimension_numbers<[1], [0], [0], [1], [0, 0, 1, 1], [], []>} : vector<24x16xbf16>, vector<16x32xbf16>, vector<24x32xf32> -> vector<24x32xf32>
    %31 = vector.broadcast %27 : vector<24x1xf32> to vector<24x32xf32>
    %32 = arith.addf %30, %31 : vector<24x32xf32>
    %cst_18 = arith.constant 5.000000e-01 : f32
    %33 = vector.broadcast %cst_18 : f32 to vector<24x32xf32>
    %34 = arith.mulf %33, %32 : vector<24x32xf32>
    %cst_19 = arith.constant 0.707106769 : f32
    %35 = vector.broadcast %cst_19 : f32 to vector<24x32xf32>
    %36 = arith.mulf %32, %35 : vector<24x32xf32>
    %37 = math.absf %36 : vector<24x32xf32>
    %cst_20 = arith.constant 0.327591091 : f32
    %38 = vector.broadcast %cst_20 : f32 to vector<24x32xf32>
    %39 = arith.mulf %38, %37 : vector<24x32xf32>
    %cst_21 = arith.constant 1.000000e+00 : f32
    %40 = vector.broadcast %cst_21 : f32 to vector<24x32xf32>
    %41 = arith.addf %40, %39 : vector<24x32xf32>
    %cst_22 = arith.constant 1.000000e+00 : f32
    %42 = vector.broadcast %cst_22 : f32 to vector<24x32xf32>
    %43 = arith.divf %42, %41 : vector<24x32xf32>
    %cst_23 = arith.constant 1.06140542 : f32
    %44 = vector.broadcast %cst_23 : f32 to vector<24x32xf32>
    %45 = arith.mulf %43, %44 : vector<24x32xf32>
    %cst_24 = arith.constant -1.45315206 : f32
    %46 = vector.broadcast %cst_24 : f32 to vector<24x32xf32>
    %47 = arith.addf %46, %45 : vector<24x32xf32>
    %48 = arith.mulf %43, %47 : vector<24x32xf32>
    %cst_25 = arith.constant 1.42141378 : f32
    %49 = vector.broadcast %cst_25 : f32 to vector<24x32xf32>
    %50 = arith.addf %49, %48 : vector<24x32xf32>
    %51 = arith.mulf %43, %50 : vector<24x32xf32>
    %cst_26 = arith.constant -0.284496725 : f32
    %52 = vector.broadcast %cst_26 : f32 to vector<24x32xf32>
    %53 = arith.addf %52, %51 : vector<24x32xf32>
    %54 = arith.mulf %43, %53 : vector<24x32xf32>
    %cst_27 = arith.constant 0.254829586 : f32
    %55 = vector.broadcast %cst_27 : f32 to vector<24x32xf32>
    %56 = arith.addf %55, %54 : vector<24x32xf32>
    %57 = arith.mulf %43, %56 : vector<24x32xf32>
    %cst_28 = arith.constant 0.000000e+00 : f32
    %58 = vector.broadcast %cst_28 : f32 to vector<24x32xf32>
    %59 = arith.subf %58, %37 : vector<24x32xf32>
    %60 = arith.mulf %59, %37 : vector<24x32xf32>
    %61 = math.exp %60 : vector<24x32xf32>
    %62 = arith.mulf %57, %61 : vector<24x32xf32>
    %cst_29 = arith.constant 1.000000e+00 : f32
    %63 = vector.broadcast %cst_29 : f32 to vector<24x32xf32>
    %64 = arith.subf %63, %62 : vector<24x32xf32>
    %cst_30 = arith.constant 0.000000e+00 : f32
    %65 = vector.broadcast %cst_30 : f32 to vector<24x32xf32>
    %66 = arith.cmpf oge, %36, %65 : vector<24x32xf32>
    %cst_31 = arith.constant 0.000000e+00 : f32
    %67 = vector.broadcast %cst_31 : f32 to vector<24x32xf32>
    %68 = arith.subf %67, %64 : vector<24x32xf32>
    %69 = arith.select %66, %64, %68 : vector<24x32xi1>, vector<24x32xf32>
    %cst_32 = arith.constant 1.000000e+00 : f32
    %70 = vector.broadcast %cst_32 : f32 to vector<24x32xf32>
    %71 = arith.addf %70, %69 : vector<24x32xf32>
    %72 = arith.mulf %34, %71 : vector<24x32xf32>
    %73 = arith.truncf %72 : vector<24x32xf32> to vector<24x32xbf16>
    %cst_33 = arith.constant dense<0.000000e+00> : vector<16x32xf32>
    %74 = tpu.matmul %26, %73, %cst_33 {dimension_numbers = #tpu.dot_dimension_numbers<[1], [0], [0], [1], [0, 0, 1, 1], [], []>} : vector<16x24xbf16>, vector<24x32xbf16>, vector<16x32xf32> -> vector<16x32xf32>
    %75 = vector.broadcast %28 : vector<16x1xf32> to vector<16x32xf32>
    %76 = arith.addf %74, %75 : vector<16x32xf32>
    %77 = arith.addf %0, %76 : vector<16x32xf32>
    %c0_34 = arith.constant 0 : index
    %c0_35 = arith.constant 0 : index
    %78 = vector.load %arg8[%c0_34, %c0_35] : memref<1x32xf32, #tpu.memory_space<vmem>>, vector<1x32xf32>
    %c0_36 = arith.constant 0 : index
    %c0_37 = arith.constant 0 : index
    %79 = vector.load %arg9[%c0_36, %c0_37] : memref<1x32xf32, #tpu.memory_space<vmem>>, vector<1x32xf32>
    %cst_38 = arith.constant dense<0.000000e+00> : vector<16xf32>
    %80 = vector.multi_reduction <add>, %77, %cst_38 [1] : vector<16x32xf32> to vector<16xf32>
    %81 = vector.shape_cast %80 : vector<16xf32> to vector<16x1xf32>
    %cst_39 = arith.constant 3.200000e+01 : f32
    %82 = vector.broadcast %cst_39 : f32 to vector<16x1xf32>
    %83 = arith.divf %81, %82 : vector<16x1xf32>
    %84 = vector.broadcast %83 : vector<16x1xf32> to vector<16x32xf32>
    %85 = arith.subf %77, %84 : vector<16x32xf32>
    %86 = arith.mulf %85, %85 : vector<16x32xf32>
    %cst_40 = arith.constant dense<0.000000e+00> : vector<16xf32>
    %87 = vector.multi_reduction <add>, %86, %cst_40 [1] : vector<16x32xf32> to vector<16xf32>
    %88 = vector.shape_cast %87 : vector<16xf32> to vector<16x1xf32>
    %cst_41 = arith.constant 3.200000e+01 : f32
    %89 = vector.broadcast %cst_41 : f32 to vector<16x1xf32>
    %90 = arith.divf %88, %89 : vector<16x1xf32>
    %cst_42 = arith.constant 9.99999997E-7 : f32
    %91 = vector.broadcast %cst_42 : f32 to vector<16x1xf32>
    %92 = arith.addf %90, %91 : vector<16x1xf32>
    %93 = math.rsqrt %92 : vector<16x1xf32>
    %94 = vector.broadcast %83 : vector<16x1xf32> to vector<16x32xf32>
    %95 = arith.subf %77, %94 : vector<16x32xf32>
    %96 = vector.broadcast %93 : vector<16x1xf32> to vector<16x32xf32>
    %97 = arith.mulf %95, %96 : vector<16x32xf32>
    %98 = vector.broadcast %78 : vector<1x32xf32> to vector<16x32xf32>
    %99 = arith.mulf %97, %98 : vector<16x32xf32>
    %100 = vector.broadcast %79 : vector<1x32xf32> to vector<16x32xf32>
    %101 = arith.addf %99, %100 : vector<16x32xf32>
    %102 = arith.truncf %101 : vector<16x32xf32> to vector<16x32xbf16>
    %c0_43 = arith.constant 0 : index
    %c0_44 = arith.constant 0 : index
    %103 = vector.load %arg10[%c0_43, %c0_44] : memref<32x64xbf16, #tpu.memory_space<vmem>>, vector<32x64xbf16>
    %cst_45 = arith.constant dense<0.000000e+00> : vector<16x64xf32>
    %104 = tpu.matmul %102, %103, %cst_45 {dimension_numbers = #tpu.dot_dimension_numbers<[1], [0], [0], [1], [0, 0, 1, 1], [], []>} : vector<16x32xbf16>, vector<32x64xbf16>, vector<16x64xf32> -> vector<16x64xf32>
    %c0_46 = arith.constant 0 : index
    %c0_47 = arith.constant 0 : index
    %105 = vector.load %arg11[%c0_46, %c0_47] : memref<1x64xf32, #tpu.memory_space<vmem>>, vector<1x64xf32>
    %106 = vector.broadcast %105 : vector<1x64xf32> to vector<16x64xf32>
    %107 = arith.addf %104, %106 : vector<16x64xf32>
    %cst_48 = arith.constant 5.000000e-01 : f32
    %108 = vector.broadcast %cst_48 : f32 to vector<16x64xf32>
    %109 = arith.mulf %108, %107 : vector<16x64xf32>
    %cst_49 = arith.constant 0.707106769 : f32
    %110 = vector.broadcast %cst_49 : f32 to vector<16x64xf32>
    %111 = arith.mulf %107, %110 : vector<16x64xf32>
    %112 = math.absf %111 : vector<16x64xf32>
    %cst_50 = arith.constant 0.327591091 : f32
    %113 = vector.broadcast %cst_50 : f32 to vector<16x64xf32>
    %114 = arith.mulf %113, %112 : vector<16x64xf32>
    %cst_51 = arith.constant 1.000000e+00 : f32
    %115 = vector.broadcast %cst_51 : f32 to vector<16x64xf32>
    %116 = arith.addf %115, %114 : vector<16x64xf32>
    %cst_52 = arith.constant 1.000000e+00 : f32
    %117 = vector.broadcast %cst_52 : f32 to vector<16x64xf32>
    %118 = arith.divf %117, %116 : vector<16x64xf32>
    %cst_53 = arith.constant 1.06140542 : f32
    %119 = vector.broadcast %cst_53 : f32 to vector<16x64xf32>
    %120 = arith.mulf %118, %119 : vector<16x64xf32>
    %cst_54 = arith.constant -1.45315206 : f32
    %121 = vector.broadcast %cst_54 : f32 to vector<16x64xf32>
    %122 = arith.addf %121, %120 : vector<16x64xf32>
    %123 = arith.mulf %118, %122 : vector<16x64xf32>
    %cst_55 = arith.constant 1.42141378 : f32
    %124 = vector.broadcast %cst_55 : f32 to vector<16x64xf32>
    %125 = arith.addf %124, %123 : vector<16x64xf32>
    %126 = arith.mulf %118, %125 : vector<16x64xf32>
    %cst_56 = arith.constant -0.284496725 : f32
    %127 = vector.broadcast %cst_56 : f32 to vector<16x64xf32>
    %128 = arith.addf %127, %126 : vector<16x64xf32>
    %129 = arith.mulf %118, %128 : vector<16x64xf32>
    %cst_57 = arith.constant 0.254829586 : f32
    %130 = vector.broadcast %cst_57 : f32 to vector<16x64xf32>
    %131 = arith.addf %130, %129 : vector<16x64xf32>
    %132 = arith.mulf %118, %131 : vector<16x64xf32>
    %cst_58 = arith.constant 0.000000e+00 : f32
    %133 = vector.broadcast %cst_58 : f32 to vector<16x64xf32>
    %134 = arith.subf %133, %112 : vector<16x64xf32>
    %135 = arith.mulf %134, %112 : vector<16x64xf32>
    %136 = math.exp %135 : vector<16x64xf32>
    %137 = arith.mulf %132, %136 : vector<16x64xf32>
    %cst_59 = arith.constant 1.000000e+00 : f32
    %138 = vector.broadcast %cst_59 : f32 to vector<16x64xf32>
    %139 = arith.subf %138, %137 : vector<16x64xf32>
    %cst_60 = arith.constant 0.000000e+00 : f32
    %140 = vector.broadcast %cst_60 : f32 to vector<16x64xf32>
    %141 = arith.cmpf oge, %111, %140 : vector<16x64xf32>
    %cst_61 = arith.constant 0.000000e+00 : f32
    %142 = vector.broadcast %cst_61 : f32 to vector<16x64xf32>
    %143 = arith.subf %142, %139 : vector<16x64xf32>
    %144 = arith.select %141, %139, %143 : vector<16x64xi1>, vector<16x64xf32>
    %cst_62 = arith.constant 1.000000e+00 : f32
    %145 = vector.broadcast %cst_62 : f32 to vector<16x64xf32>
    %146 = arith.addf %145, %144 : vector<16x64xf32>
    %147 = arith.mulf %109, %146 : vector<16x64xf32>
    %148 = arith.truncf %147 : vector<16x64xf32> to vector<16x64xbf16>
    %c0_63 = arith.constant 0 : index
    %c0_64 = arith.constant 0 : index
    %149 = vector.load %arg12[%c0_63, %c0_64] : memref<64x32xbf16, #tpu.memory_space<vmem>>, vector<64x32xbf16>
    %cst_65 = arith.constant dense<0.000000e+00> : vector<16x32xf32>
    %150 = tpu.matmul %148, %149, %cst_65 {dimension_numbers = #tpu.dot_dimension_numbers<[1], [0], [0], [1], [0, 0, 1, 1], [], []>} : vector<16x64xbf16>, vector<64x32xbf16>, vector<16x32xf32> -> vector<16x32xf32>
    %c0_66 = arith.constant 0 : index
    %c0_67 = arith.constant 0 : index
    %151 = vector.load %arg13[%c0_66, %c0_67] : memref<1x32xf32, #tpu.memory_space<vmem>>, vector<1x32xf32>
    %152 = vector.broadcast %151 : vector<1x32xf32> to vector<16x32xf32>
    %153 = arith.addf %150, %152 : vector<16x32xf32>
    %154 = arith.addf %77, %153 : vector<16x32xf32>
    %c0_68 = arith.constant 0 : index
    %c0_69 = arith.constant 0 : index
    %155 = vector.load %arg14[%c0_68, %c0_69] : memref<16x32xf32, #tpu.memory_space<vmem>>, vector<16x32xf32>
    tpu.vector_store %arg14[%c0_68, %c0_69], %154 {strides = array<i32>} : memref<16x32xf32, #tpu.memory_space<vmem>>, vector<16x32xf32>,
    return
  }
  func.func @transform_0(%arg0: i32) -> (i32, i32) {
    %c0_i32 = arith.constant 0 : i32
    %c0_i32_0 = arith.constant 0 : i32
    return %arg0, %c0_i32 : i32, i32
  }
  func.func @transform_1(%arg0: i32) -> (i32, i32) {
    %c0_i32 = arith.constant 0 : i32
    %c0_i32_0 = arith.constant 0 : i32
    %c0_i32_1 = arith.constant 0 : i32
    return %c0_i32, %c0_i32_0 : i32, i32
  }
  func.func @transform_2(%arg0: i32) -> (i32, i32) {
    %c0_i32 = arith.constant 0 : i32
    %c0_i32_0 = arith.constant 0 : i32
    %c0_i32_1 = arith.constant 0 : i32
    return %c0_i32, %c0_i32_0 : i32, i32
  }
  func.func @transform_3(%arg0: i32) -> (i32, i32) {
    %c0_i32 = arith.constant 0 : i32
    %c0_i32_0 = arith.constant 0 : i32
    %c0_i32_1 = arith.constant 0 : i32
    return %c0_i32, %c0_i32_0 : i32, i32
  }
  func.func @transform_4(%arg0: i32) -> (i32, i32) {
    %c0_i32 = arith.constant 0 : i32
    %c0_i32_0 = arith.constant 0 : i32
    %c0_i32_1 = arith.constant 0 : i32
    return %c0_i32, %c0_i32_0 : i32, i32
  }
  func.func @transform_5(%arg0: i32) -> (i32, i32) {
    %c0_i32 = arith.constant 0 : i32
    %c0_i32_0 = arith.constant 0 : i32
    %c0_i32_1 = arith.constant 0 : i32
    return %c0_i32, %c0_i32_0 : i32, i32
  }
  func.func @transform_6(%arg0: i32) -> (i32, i32) {
    %c0_i32 = arith.constant 0 : i32
    %c0_i32_0 = arith.constant 0 : i32
    %c0_i32_1 = arith.constant 0 : i32
    return %c0_i32, %c0_i32_0 : i32, i32
  }
  func.func @transform_7(%arg0: i32) -> (i32, i32) {
    %c0_i32 = arith.constant 0 : i32
    %c0_i32_0 = arith.constant 0 : i32
    %c0_i32_1 = arith.constant 0 : i32
    return %c0_i32, %c0_i32_0 : i32, i32
  }
  func.func @transform_8(%arg0: i32) -> (i32, i32) {
    %c0_i32 = arith.constant 0 : i32
    %c0_i32_0 = arith.constant 0 : i32
    %c0_i32_1 = arith.constant 0 : i32
    return %c0_i32, %c0_i32_0 : i32, i32
  }
  func.func @transform_9(%arg0: i32) -> (i32, i32) {
    %c0_i32 = arith.constant 0 : i32
    %c0_i32_0 = arith.constant 0 : i32
    %c0_i32_1 = arith.constant 0 : i32
    return %c0_i32, %c0_i32_0 : i32, i32
  }
  func.func @transform_10(%arg0: i32) -> (i32, i32) {
    %c0_i32 = arith.constant 0 : i32
    %c0_i32_0 = arith.constant 0 : i32
    %c0_i32_1 = arith.constant 0 : i32
    return %c0_i32, %c0_i32_0 : i32, i32
  }
  func.func @transform_11(%arg0: i32) -> (i32, i32) {
    %c0_i32 = arith.constant 0 : i32
    %c0_i32_0 = arith.constant 0 : i32
    %c0_i32_1 = arith.constant 0 : i32
    return %c0_i32, %c0_i32_0 : i32, i32
  }
  func.func @transform_12(%arg0: i32) -> (i32, i32) {
    %c0_i32 = arith.constant 0 : i32
    %c0_i32_0 = arith.constant 0 : i32
    %c0_i32_1 = arith.constant 0 : i32
    return %c0_i32, %c0_i32_0 : i32, i32
  }
  func.func @transform_13(%arg0: i32) -> (i32, i32) {
    %c0_i32 = arith.constant 0 : i32
    %c0_i32_0 = arith.constant 0 : i32
    return %arg0, %c0_i32 : i32, i32
  }
}

</mosaic_0001>

<bundles_post_ra>
// kernel: tpu_custom_call.1
= control target key start
LH: loop header
LB: loop body
LE: loop exit
PB: predicated region body
PF: predicated region fallthrough
CT: control target
= control target key end

     0   :  { %s1597_s0 = inlined_call_operand.vmem [shape: f32[32,32], index: 0, kind: input, shape index: {}]   ;;  %s1598_s1 = inlined_call_operand.vmem [shape: f32[1,32], index: 1, kind: input, shape index: {}]   ;;  %s1599_s2 = inlined_call_operand.vmem [shape: f32[1,32], index: 2, kind: input, shape index: {}]   ;;  %s1600_s3 = inlined_call_operand.vmem [shape: bf16[24,16], index: 3, kind: input, shape index: {}]   ;;  %s1601_s4 = inlined_call_operand.vmem [shape: f32[24,1], index: 4, kind: input, shape index: {}]   ;;  %s1602_s5 = inlined_call_operand.vmem [shape: bf16[16,24], index: 5, kind: input, shape index: {}]   ;;  %s1603_s6 = inlined_call_operand.vmem [shape: f32[16,1], index: 6, kind: input, shape index: {}]   ;;  %s1604_s7 = inlined_call_operand.vmem [shape: f32[1,32], index: 7, kind: input, shape index: {}]   ;;  %s1605_s8 = inlined_call_operand.vmem [shape: f32[1,32], index: 8, kind: input, shape index: {}]   ;;  %s1606_s9 = inlined_call_operand.vmem [shape: bf16[32,64], index: 9, kind: input, shape index: {}]   ;;  %s1607_s10 = inlined_call_operand.vmem [shape: f32[1,64], index: 10, kind: input, shape index: {}]   ;;  %s1608_s11 = inlined_call_operand.vmem [shape: bf16[64,32], index: 11, kind: input, shape index: {}]   ;;  %s1609_s12 = inlined_call_operand.vmem [shape: f32[1,32], index: 12, kind: input, shape index: {}]   ;;  %s1610_s13 = inlined_call_operand.hbm [shape: f32[32,32], index: 13, kind: output, shape index: {}]  }
   0x1   :  { %1611 = sst [smem:[#allocation5_spill]] %s1597_s0 }
   0x2   :  { %1612 = sst [smem:[#allocation6_spill]] %s1598_s1 }
   0x3   :  { %18 = vsyncpa [#allocation3], 0 }
   0x4   :  { %20 = vsyncpa [#allocation3 + $0x1], 0  ;;  %s1364_s25 = smov 0   ;;  %s1366_s26 = smov 0  }
   0x5   :  { %s1368_s27 = smov 0   ;;  %s1370_s28 = smov 0  }
   0x6 LB: > { %s1385_s29 = sadd.s32 4294967295, %s1286_s28   ;;  %s1060_s30 = sadd.s32 4294967294, %s1286_s28   ;;  %s1286_s28 = sphi %s1370_s28, %s1620_s28   ;;  %s1282_s27 = sphi %s1368_s27, %s1619_s27   ;;  %s1278_s26 = sphi %s1366_s26, %s1618_s26   ;;  %s1274_s25 = sphi %s1364_s25, %s1617_s25  }
   0x7   : > { %s1389_s14 = sadd.s32 1, %s1286_s28   ;;  %s311_s15 = sadd.s32 1, %s1282_s27 }
   0x8   : > { %s308_s16 = ssub.s32 %s1286_s28, %s1389_s14  ;;  %p321_p0 = scmp.ne.s32.totalorder %s1282_s27, %s1278_s26 }
   0x9   : > { %p309_p1 = scmp.eq.s32.totalorder %s308_s16, 0  ;;  %p322_p2 = scmp.eq.s32.totalorder %s1385_s29, 1 }
   0xa   : > { %p327_p3 = scmp.ne.s32.totalorder %s1278_s26, %s1274_s25  ;;  %p328_p4 = scmp.eq.s32.totalorder %s1060_s30, 1 }
   0xb   : > { %s1400_s17 = scalar_select %p309_p1, %s1282_s27, %s311_s15  }
   0xc   : > { %p1402_p5 = por %p322_p2, %p321_p0  ;;  %p1406_p6 = por %p328_p4, %p327_p3 }
   0xd   : > { %p1063_p7 = scmp.ge.s32.totalorder %s1286_s28, 1  ;;  %p391_p8 = scmp.lt.s32.totalorder %s1286_s28, 3 }
   0xf   : > { %p392_p9 = pnand %p1063_p7, %p391_p8 }
  0x10   : > { %s1065_s20 = sshll.u32 (!%p392_p9), %s1385_s29, 1  ;;  %vm447_vm0 = vcmask (!%p392_p9), 261120   ;;  %s1615_s0 = sld [smem:[#allocation5_spill]] (!%p392_p9)  ;;  %v1187_v14 = vld [vmem:[%s1600_s3] sm:$0xff] (!%p392_p9)   ;;  %vm525_vm1 = vcmask (!%p392_p9), 130048   ;;  %v497_v15 = vld [vmem:[%s1601_s4 + $0x8] sm:$0xff] (!%p392_p9) }
  0x11   : > { %395 = sbr.rel (%p392_p9) target bundleno = 1659 (0x67b), region = 72  ;;  %p436_p10 = scmp.lt.s32.totalorder (!%p392_p9), %s1065_s20, 3  ;;  %1109 = vmatprep.mubr.msk.bf16.mxu0 (!%p392_p9), %vm525_vm1, %v1187_v14  ;;  %v1288_v16 = vmov (!%p392_p9), 0   ;;  %v496_v17 = vld [vmem:[%s1601_s4] sm:$0xff] (!%p392_p9)  ;;  %v498_v18 = vld [vmem:[%s1601_s4 + $0x10] sm:$0xff] (!%p392_p9)  ;;  %v500_v20 = vld [vmem:[%s1603_s6 + $0x8] sm:$0xff] (!%p392_p9) }
  0x12   : > { %1186 = vset.pattern.permute.xlu1 (!%p392_p9), %v1288_v16  ;;  %1185 = vset.pattern.permute.xlu0 (!%p392_p9), %v1288_v16  ;;  %v499_v19 = vld [vmem:[%s1603_s6] sm:$0xff] (!%p392_p9)  ;;  %s1616_s1 = sld [smem:[#allocation6_spill]] (!%p392_p9)  ;;  %v1188_v38 = vld [vmem:[%s1600_s3 + $0x8] ss:$0 sps:$4 sm:$0xff] (!%p392_p9)   ;;  %v1289_v39 = vmov (!%p392_p9), 0.0   ;;  %vm1290_vm2 = vmmov (!%p392_p9), 0  }
  0x13   : > { %v1068_v33 = vld [vmem:[%s1599_s2] ss:$0 sm:$0xff] (!%p392_p9)  ;;  %1129 = vmatprep.subr.bf16.mxu1 (!%p392_p9), %v1289_v39  ;;  %1137 = vmatprep.mubr.msk.bf16.mxu1 (!%p392_p9), %vm1290_vm2, %v1289_v39  ;;  %vm682_vm6 = vcmask (!%p392_p9), 1043456   ;;  %vm678_vm7 = vcmask (!%p392_p9), 195584   ;;  %vm935_vm10 = vcmask (!%p392_p9), 523264   ;;  %s432_s23 = sand.u32 (!%p392_p9), 1, %s1278_s26  }
  0x18   : > { %s1622_s20 = smov (!%p436_p10, %s1065_s20), 3  ;;  %v1067_v29 = vld [vmem:[%s1616_s1] ss:$0 sm:$0xff] }
  0x19   : > { %s1066_s21 = sshll.u32 %s1622_s20, 3 }
  0x1a   : > { %s439_s24 = scalar_lea.vmem %s1615_s0, %s1066_s21  ;;  %s1092_s21 = sshll.u32 %s1385_s29, 8 }
  0x1b   : > { %v1416_v0 = vld [vmem:[%s439_s24] sm:$0xff]  ;;  %v1418_v1 = vld [vmem:[%s439_s24 + $0x8] sm:$0xff]  ;;  %s1064_s24 = sshll.u32 %s432_s23, 4  ;;  %s1549_s1 = scalar_lea.hbm %s1610_s13, %s1092_s21 }
  0x1c   : > { %v448_v2 = vsel %vm447_vm0, %v1416_v0, 0.0  ;;  %v451_v3 = vsel %vm447_vm0, %v1418_v1, 0.0  ;;  %s434_s16 = scalar_lea.vmem [#allocation2], %s1064_s24  ;;  %s1556_s29 = scalar_lea.sflag [#allocation3], %s432_s23 }
  0x1d   : > { %449 = vadd.xlane.f32.xlu0 %v448_v2  ;;  %s998_s20 = sshll.u32 %s434_s16, 4  ;;  %s1291_s0 = smov [#allocation2]   ;;  %s1551_s20 = int_to_ptr.vmem [resolvable:$true] %s998_s20 }
  0x1e   : > { %s1224_s24 = scalar_lea.vmem %s1551_s20, 256  ;;  %s1228_s30 = sshll.u32 %s1291_s0, 4  ;;  %s1229_s30 = int_to_ptr.vmem [resolvable:$false] %s1228_s30 }
  0x1f   : > { %p1225_p11 = scmp.ne.s32.totalorder %s1551_s20, %s1224_s24  ;;  %s1230_s15 = scalar_lea.vmem %s1229_s30, 512 }
  0x20   : > { %p1231_p0 = scmp.lt.s32.totalorder %s1551_s20, %s1229_s30  ;;  %p1232_p1 = scmp.lt.s32.totalorder %s1230_s15, %s1224_s24 }
  0x21   : > { %452 = vadd.xlane.f32.xlu0 %v451_v3  ;;  %p1226_p12 = pnand %p1225_p11, %p1402_p5 }
  0x22   : > { %p1233_p2 = por %p1232_p1, %p1231_p0 }
  0x23   : > { %p1227_p13 = pneg %p1226_p12 }
  0x25   : > { %p1234_p3 = pnand %p1233_p2, %p1227_p13 }
  0x37   : > { %504 = vperm.xlu0 %1185, %v496_v17  }
  0xaa   : > { %v450_v4 = vpop.xlane.xlu0 %449 }
  0xab   : > { %v455_v5 = vmul.f32 0.03125, %v450_v4 }
  0xad   : > { %v457_v6 = vsub.f32 %v1416_v0, %v455_v5 }
  0xae   : > { %v453_v7 = vpop.xlane.xlu0 %452 }
  0xaf   : > { %v456_v8 = vmul.f32 0.03125, %v453_v7  ;;  %v459_v9 = vmul.f32 %v457_v6, %v457_v6 }
  0xb1   : > { %v458_v10 = vsub.f32 %v1418_v1, %v456_v8  ;;  %v461_v11 = vsel %vm447_vm0, %v459_v9, 0.0 }
  0xb2   : > { %462 = vadd.xlane.f32.xlu1 %v461_v11 }
  0xb3   : > { %v460_v12 = vmul.f32 %v458_v10, %v458_v10 }
  0xb5   : > { %v464_v13 = vsel %vm447_vm0, %v460_v12, 0.0 }
  0xb6   : > { %465 = vadd.xlane.f32.xlu1 %v464_v13  ;;  %v505_v41 = vpop.permute.xlu0 %504 }
  0xc7   : > { %509 = vperm.xlu1 %1186, %v497_v15  }
  0xcb   : > { %514 = vperm.xlu1 %1186, %v498_v18  }
  0xcf   : > { %665 = vperm.xlu1 %1186, %v499_v19  }
  0xd3   : > { %670 = vperm.xlu1 %1186, %v500_v20  }
 0x13f   : > { %v463_v21 = vpop.xlane.xlu1 %462 }
 0x140   : > { %v467_v22 = vmul.f32 0.03125, %v463_v21 }
 0x142   : > { %v469_v23 = vadd.f32 1e-06, %v467_v22 }
 0x143   : > { %v466_v24 = vpop.xlane.xlu1 %465 }
 0x144   : > { %1196 = vrsqrt.f32 %v469_v23  ;;  %v468_v25 = vmul.f32 0.03125, %v466_v24 }
 0x146   : > { %v470_v26 = vadd.f32 1e-06, %v468_v25 }
 0x147   : > { %v510_v40 = vpop.permute.xlu1 %509 }
 0x148   : > { %1198 = vrsqrt.f32 %v470_v26 }
 0x14b   : > { %v515_v42 = vpop.permute.xlu1 %514 }
 0x14e   : > { %v1197_v27 = vpop.eup %1196 }
 0x14f   : > { %v473_v28 = vmul.f32 %v1197_v27, %v457_v6 }
 0x151   : > { %v481_v32 = vmul.f32 %v1067_v29, %v473_v28 }
 0x152   : > { %v1199_v30 = vpop.eup %1198 }
 0x153   : > { %v474_v31 = vmul.f32 %v1199_v30, %v458_v10  ;;  %v489_v35 = vadd.f32 %v1068_v33, %v481_v32 }
 0x155   : > { %v482_v34 = vmul.f32 %v1067_v29, %v474_v31 }
 0x157   : > { %v490_v36 = vadd.f32 %v1068_v33, %v482_v34 }
 0x159   : > { %v501_v37 = vpack.c.bf16 %v490_v36, %v489_v35 }
 0x15b   : > { %1107 = vmatprep.subr.bf16.mxu0 %v501_v37 }
 0x15c   : > { %1108 = vmatpush3.bf16.msra.mxu0 %v501_v37 }
 0x15d   : > { %1113 = vmatprep.subr.bf16.mxu0 %v1289_v39 }
 0x15f   : > { %1110 = vmatmul.mubr.msk.bf16.vlgmr.msra.gmra.mrb[0].mxu0 %vm525_vm1, %v1188_v38 }
 0x160   : > { %1117 = vmatprep.mubr.msk.bf16.mxu0 %vm1290_vm2, %v1289_v39 }
 0x232   : > { %v1111_v43 = vpop.f32.mrb[0].mxu0 }
 0x233   : > { %v1463_v44 = vadd.f32 %v1111_v43, %v515_v42  ;;  %v566_v45 = vpop.f32.mrb[1].mxu0 }
 0x234   : > { %v1465_v46 = vadd.f32 %v566_v45, %v505_v41  ;;  %v1112_v47 = vpop.f32.mrb[2].mxu0 }
 0x235   : > { %v1468_v48 = vmul.f32 0.70710677, %v1463_v44  ;;  %v569_v49 = vpop.f32.mrb[3].mxu0 }
 0x236   : > { %v1471_v50 = vmul.f32 0.70710677, %v1465_v46  ;;  %v1473_v51 = vadd.f32 %v569_v49, %v510_v40 }
 0x237   : > { %v588_v52 = vand.u32 2147483647, %v1468_v48  ;;  %vm648_vm3 = vcmp.ge.f32.partialorder %v1468_v48, 0.0 }
 0x238   : > { %v586_v53 = vand.u32 2147483647, %v1471_v50  ;;  %v1478_v54 = vmul.f32 0.70710677, %v1473_v51  ;;  %vm646_vm4 = vcmp.ge.f32.partialorder %v1471_v50, 0.0 }
 0x239   : > { %v591_v55 = vmul.f32 0.3275911, %v588_v52  ;;  %v630_v62 = vsub.f32 0.0, %v588_v52 }
 0x23a   : > { %v589_v56 = vmul.f32 0.3275911, %v586_v53  ;;  %v587_v57 = vand.u32 2147483647, %v1478_v54  ;;  %v628_v63 = vsub.f32 0.0, %v586_v53  ;;  %vm647_vm5 = vcmp.ge.f32.partialorder %v1478_v54, 0.0 }
 0x23b   : > { %v594_v58 = vadd.f32 1.0, %v591_v55  ;;  %v633_v3 = vmul.f32 %v630_v62, %v588_v52  ;;  %v582_v62 = vmul.f32 0.5, %v1463_v44  ;;  %v1189_v44 = vld [vmem:[%s1602_s5] sm:$0xff]  }
 0x23c   : > { %v592_v59 = vadd.f32 1.0, %v589_v56  ;;  %v590_v60 = vmul.f32 0.3275911, %v587_v57  ;;  %v629_v4 = vsub.f32 0.0, %v587_v57  ;;  %v631_v7 = vmul.f32 %v628_v63, %v586_v53 }
 0x23d   : > { %1200 = vrcp.f32 %v594_v58  ;;  %v638_v11 = vmul.f32 1.442695, %v633_v3  ;;  %v581_v3 = vmul.f32 0.5, %v1473_v51 }
 0x23e   : > { %1202 = vrcp.f32 %v592_v59  ;;  %v593_v61 = vadd.f32 1.0, %v590_v60  ;;  %v632_v13 = vmul.f32 %v629_v4, %v587_v57  ;;  %v634_v15 = vmul.f32 1.442695, %v631_v7 }
 0x240   : > { %1204 = vrcp.f32 %v593_v61  ;;  %v636_v21 = vmul.f32 1.442695, %v632_v13 }
 0x241   : > { %1206 = vpow2.f32 %v638_v11 }
 0x242   : > { %1208 = vpow2.f32 %v634_v15 }
 0x243   : > { %1210 = vpow2.f32 %v636_v21 }
 0x247   : > { %v1201_v2 = vpop.eup %1200 }
 0x248   : > { %v1203_v5 = vpop.eup %1202  ;;  %v603_v6 = vmul.f32 1.0614054, %v1201_v2 }
 0x249   : > { %v601_v8 = vmul.f32 1.0614054, %v1203_v5 }
 0x24a   : > { %v606_v9 = vadd.f32 -1.4531521, %v603_v6  ;;  %v1205_v10 = vpop.eup %1204 }
 0x24b   : > { %v604_v12 = vadd.f32 -1.4531521, %v601_v8  ;;  %v602_v16 = vmul.f32 1.0614054, %v1205_v10  ;;  %v1207_v36 = vpop.eup %1206 }
 0x24c   : > { %v609_v14 = vmul.f32 %v1201_v2, %v606_v9  ;;  %v1209_v38 = vpop.eup %1208 }
 0x24d   : > { %v607_v17 = vmul.f32 %v1203_v5, %v604_v12  ;;  %v605_v19 = vadd.f32 -1.4531521, %v602_v16  ;;  %v1211_v47 = vpop.eup %1210 }
 0x24e   : > { %v612_v18 = vadd.f32 1.4214138, %v609_v14 }
 0x24f   : > { %v610_v20 = vadd.f32 1.4214138, %v607_v17  ;;  %v608_v23 = vmul.f32 %v1205_v10, %v605_v19 }
 0x250   : > { %v615_v22 = vmul.f32 %v1201_v2, %v612_v18 }
 0x251   : > { %v613_v24 = vmul.f32 %v1203_v5, %v610_v20  ;;  %v611_v26 = vadd.f32 1.4214138, %v608_v23 }
 0x252   : > { %v618_v25 = vadd.f32 -0.28449672, %v615_v22 }
 0x253   : > { %v616_v27 = vadd.f32 -0.28449672, %v613_v24  ;;  %v614_v29 = vmul.f32 %v1205_v10, %v611_v26  ;;  %v1190_v26 = vld [vmem:[%s1606_s9] sm:$0xff]  }
 0x254   : > { %v621_v28 = vmul.f32 %v1201_v2, %v618_v25 }
 0x255   : > { %v619_v30 = vmul.f32 %v1203_v5, %v616_v27  ;;  %v617_v32 = vadd.f32 -0.28449672, %v614_v29  ;;  %v1191_v27 = vld [vmem:[%s1606_s9 + $0x8] sm:$0xff]  }
 0x256   : > { %v624_v31 = vadd.f32 0.2548296, %v621_v28 }
 0x257   : > { %v622_v33 = vadd.f32 0.2548296, %v619_v30  ;;  %v620_v35 = vmul.f32 %v1205_v10, %v617_v32 }
 0x258   : > { %v627_v34 = vmul.f32 %v1201_v2, %v624_v31  ;;  %v580_v2 = vmul.f32 0.5, %v1465_v46  ;;  %v666_v46 = vpop.permute.xlu1 %665 }
 0x259   : > { %v625_v37 = vmul.f32 %v1203_v5, %v622_v33  ;;  %v623_v41 = vadd.f32 0.2548296, %v620_v35 }
 0x25a   : > { %v642_v40 = vmul.f32 %v1207_v36, %v627_v34  ;;  %v1075_v36 = vld [vmem:[%s1604_s7] ss:$0 sm:$0xff] }
 0x25b   : > { %v640_v42 = vmul.f32 %v1209_v38, %v625_v37  ;;  %v626_v45 = vmul.f32 %v1205_v10, %v623_v41  ;;  %v1076_v41 = vld [vmem:[%s1605_s8] ss:$0 sm:$0xff] }
 0x25c   : > { %v645_v43 = vsub.f32 1.0, %v642_v40  ;;  %v671_v10 = vpop.permute.xlu1 %670 }
 0x25d   : > { %v643_v49 = vsub.f32 1.0, %v640_v42  ;;  %v641_v53 = vmul.f32 %v1211_v47, %v626_v45 }
 0x25e   : > { %v651_v52 = vsub.f32 0.0, %v645_v43 }
 0x25f   : > { %v649_v55 = vsub.f32 0.0, %v643_v49  ;;  %v644_v57 = vsub.f32 1.0, %v641_v53  ;;  %v1194_v53 = vld [vmem:[%s1608_s11 + $0x10] sm:$0xff]  }
 0x260   : > { %v654_v56 = vsel %vm648_vm3, %v645_v43, %v651_v52  ;;  %v1193_v52 = vld [vmem:[%s1608_s11 + $0x8] sm:$0xff]  }
 0x261   : > { %v652_v58 = vsel %vm646_vm4, %v643_v49, %v649_v55  ;;  %v657_v59 = vadd.f32 1.0, %v654_v56  ;;  %v650_v60 = vsub.f32 0.0, %v644_v57  ;;  %v1192_v49 = vld [vmem:[%s1608_s11] sm:$0xff]   ;;  %v1195_v55 = vld [vmem:[%s1608_s11 + $0x18] sm:$0xff]  }
 0x262   : > { %v655_v61 = vadd.f32 1.0, %v652_v58  ;;  %1130 = vmatpush3.bf16.msra.mxu1 %v1192_v49  ;;  %v1077_v56 = vld [vmem:[%s1607_s10] ss:$0 sm:$0xff] }
 0x263   : > { %v653_v63 = vsel %vm647_vm5, %v644_v57, %v650_v60  ;;  %v660_v48 = vmul.f32 %v657_v59, %v582_v62  ;;  %1131 = vmatprep.subr.bf16.mxu1 %v1289_v39  ;;  %v1081_v49 = vld [vmem:[%s1609_s12] ss:$0 sm:$0xff] }
 0x264   : > { %v656_v4 = vadd.f32 1.0, %v653_v63  ;;  %v658_v5 = vmul.f32 %v655_v61, %v580_v2 }
 0x265   : > { %v662_v50 = vpack.c.bf16 %v660_v48, %v660_v48 }
 0x266   : > { %v659_v6 = vmul.f32 %v656_v4, %v581_v3  ;;  %1132 = vmatpush3.bf16.msra.mxu1 %v1193_v52 }
 0x267   : > { %v684_v8 = vsel %vm682_vm6, %v662_v50, 0  ;;  %1133 = vmatprep.subr.bf16.mxu1 %v1289_v39 }
 0x268   : > { %v661_v7 = vpack.c.bf16 %v659_v6, %v658_v5 }
 0x26a   : > { %1114 = vmatpush3.bf16.msra.mxu0 %v661_v7  ;;  %1134 = vmatpush3.bf16.msra.mxu1 %v1194_v53 }
 0x26b   : > { %1115 = vmatprep.subr.bf16.mxu0 %v1289_v39  ;;  %1135 = vmatprep.subr.bf16.mxu1 %v1289_v39 }
 0x26e   : > { %1116 = vmatpush3.bf16.msra.mxu0 %v684_v8  ;;  %1136 = vmatpush3.bf16.msra.mxu1 %v1195_v55 }
 0x26f   : > { %1121 = vmatprep.subr.bf16.mxu0 %v1289_v39 }
 0x271   : > { %1118 = vmatmul.mubr.msk.bf16.vlgmr.msra.gmra.mrb[4].mxu0 %vm678_vm7, %v1189_v44 }
 0x272   : > { %1125 = vmatprep.mubr.msk.bf16.mxu0 %vm1290_vm2, %v1289_v39  ;;  %1122 = vmatpush3.bf16.msra.mxu0 %v1190_v26 }
 0x273   : > { %1123 = vmatprep.subr.bf16.mxu0 %v1289_v39 }
 0x276   : > { %1124 = vmatpush3.bf16.msra.mxu0 %v1191_v27 }
 0x344   : > { %v720_v51 = vpop.f32.mrb[4].mxu0 }
 0x345   : > { %v721_v54 = vadd.f32 %v720_v51, %v666_v46  ;;  %v1119_v9 = vpop.f32.mrb[5].mxu0 }
 0x346   : > { %v723_v11 = vpop.f32.mrb[6].mxu0 }
 0x347   : > { %v1495_v12 = vadd.f32 %v721_v54, %v1416_v0  ;;  %v724_v13 = vadd.f32 %v723_v11, %v671_v10  ;;  %v1120_v14 = vpop.f32.mrb[7].mxu0 }
 0x349   : > { %v1498_v15 = vadd.f32 %v724_v13, %v1418_v1  ;;  %v731_v16 = vsel %vm447_vm0, %v1495_v12, 0.0 }
 0x34a   : > { %732 = vadd.xlane.f32.xlu1 %v731_v16 }
 0x34b   : > { %v734_v17 = vsel %vm447_vm0, %v1498_v15, 0.0 }
 0x34c   : > { %735 = vadd.xlane.f32.xlu0 %v734_v17 }
 0x3d7   : > { %v733_v18 = vpop.xlane.xlu1 %732 }
 0x3d8   : > { %v737_v19 = vmul.f32 0.03125, %v733_v18 }
 0x3d9   : > { %v736_v20 = vpop.xlane.xlu0 %735 }
 0x3da   : > { %v739_v21 = vsub.f32 %v1495_v12, %v737_v19  ;;  %v738_v0 = vmul.f32 0.03125, %v736_v20 }
 0x3dc   : > { %v740_v22 = vsub.f32 %v1498_v15, %v738_v0  ;;  %v741_v23 = vmul.f32 %v739_v21, %v739_v21 }
 0x3de   : > { %v743_v1 = vsel %vm447_vm0, %v741_v23, 0.0  ;;  %v742_v24 = vmul.f32 %v740_v22, %v740_v22 }
 0x3df   : > { %744 = vadd.xlane.f32.xlu1 %v743_v1 }
 0x3e0   : > { %v746_v25 = vsel %vm447_vm0, %v742_v24, 0.0 }
 0x3e3   : > { %747 = vadd.xlane.f32.xlu1 %v746_v25 }
 0x46c   : > { %v745_v28 = vpop.xlane.xlu1 %744 }
 0x46d   : > { %v749_v29 = vmul.f32 0.03125, %v745_v28 }
 0x46f   : > { %v751_v30 = vadd.f32 1e-06, %v749_v29 }
 0x470   : > { %v748_v31 = vpop.xlane.xlu1 %747 }
 0x471   : > { %1212 = vrsqrt.f32 %v751_v30  ;;  %v750_v32 = vmul.f32 0.03125, %v748_v31 }
 0x473   : > { %v752_v33 = vadd.f32 1e-06, %v750_v32 }
 0x475   : > { %1214 = vrsqrt.f32 %v752_v33 }
 0x47b   : > { %v1213_v34 = vpop.eup %1212 }
 0x47c   : > { %v755_v35 = vmul.f32 %v1213_v34, %v739_v21 }
 0x47e   : > { %v763_v38 = vmul.f32 %v1075_v36, %v755_v35 }
 0x47f   : > { %v1215_v37 = vpop.eup %1214 }
 0x480   : > { %v756_v40 = vmul.f32 %v1215_v37, %v740_v22  ;;  %v771_v43 = vadd.f32 %v1076_v41, %v763_v38 }
 0x482   : > { %v764_v42 = vmul.f32 %v1075_v36, %v756_v40 }
 0x484   : > { %v772_v45 = vadd.f32 %v1076_v41, %v764_v42 }
 0x486   : > { %v773_v47 = vpack.c.bf16 %v772_v45, %v771_v43 }
 0x488   : > { %1126 = vmatmul.mubr.msk.bf16.vlgmr.msra.gmra.mrb[8].mxu0 %vm447_vm0, %v773_v47 }
 0x55b   : > { %v834_v57 = vpop.f32.mrb[8].mxu0 }
 0x55c   : > { %v835_v58 = vadd.f32 %v1077_v56, %v834_v57  ;;  %v1127_v59 = vpop.f32.mrb[9].mxu0 }
 0x55d   : > { %v837_v60 = vpop.f32.mrb[10].mxu0 }
 0x55e   : > { %v843_v61 = vmul.f32 0.70710677, %v835_v58  ;;  %v838_v62 = vadd.f32 %v1077_v56, %v837_v60  ;;  %v1128_v63 = vpop.f32.mrb[11].mxu0  ;;  %v841_v40 = vmul.f32 0.5, %v835_v58 }
 0x560   : > { %v845_v2 = vand.u32 2147483647, %v843_v61  ;;  %v844_v3 = vmul.f32 0.70710677, %v838_v62  ;;  %vm885_vm8 = vcmp.ge.f32.partialorder %v843_v61, 0.0  ;;  %v842_v41 = vmul.f32 0.5, %v838_v62 }
 0x562   : > { %v847_v4 = vmul.f32 0.3275911, %v845_v2  ;;  %v846_v39 = vand.u32 2147483647, %v844_v3  ;;  %v873_v7 = vsub.f32 0.0, %v845_v2  ;;  %vm886_vm9 = vcmp.ge.f32.partialorder %v844_v3, 0.0 }
 0x564   : > { %v849_v48 = vadd.f32 1.0, %v847_v4  ;;  %v848_v5 = vmul.f32 0.3275911, %v846_v39  ;;  %v874_v50 = vsub.f32 0.0, %v846_v39  ;;  %v875_v44 = vmul.f32 %v873_v7, %v845_v2 }
 0x566   : > { %1216 = vrcp.f32 %v849_v48  ;;  %v850_v6 = vadd.f32 1.0, %v848_v5  ;;  %v876_v9 = vmul.f32 %v874_v50, %v846_v39  ;;  %v877_v10 = vmul.f32 1.442695, %v875_v44 }
 0x568   : > { %1218 = vrcp.f32 %v850_v6  ;;  %v879_v17 = vmul.f32 1.442695, %v876_v9 }
 0x569   : > { %1220 = vpow2.f32 %v877_v10 }
 0x56a   : > { %1222 = vpow2.f32 %v879_v17 }
 0x570   : > { %v1217_v8 = vpop.eup %1216 }
 0x571   : > { %v855_v46 = vmul.f32 1.0614054, %v1217_v8 }
 0x572   : > { %v1219_v51 = vpop.eup %1218 }
 0x573   : > { %v857_v54 = vadd.f32 -1.4531521, %v855_v46  ;;  %v856_v11 = vmul.f32 1.0614054, %v1219_v51  ;;  %v1221_v26 = vpop.eup %1220 }
 0x574   : > { %v1223_v30 = vpop.eup %1222 }
 0x575   : > { %v859_v13 = vmul.f32 %v1217_v8, %v857_v54  ;;  %v858_v14 = vadd.f32 -1.4531521, %v856_v11 }
 0x577   : > { %v861_v16 = vadd.f32 1.4214138, %v859_v13  ;;  %v860_v18 = vmul.f32 %v1219_v51, %v858_v14 }
 0x579   : > { %v863_v19 = vmul.f32 %v1217_v8, %v861_v16  ;;  %v862_v20 = vadd.f32 1.4214138, %v860_v18 }
 0x57b   : > { %v865_v21 = vadd.f32 -0.28449672, %v863_v19  ;;  %v864_v0 = vmul.f32 %v1219_v51, %v862_v20 }
 0x57d   : > { %v867_v22 = vmul.f32 %v1217_v8, %v865_v21  ;;  %v866_v23 = vadd.f32 -0.28449672, %v864_v0 }
 0x57f   : > { %v869_v1 = vadd.f32 0.2548296, %v867_v22  ;;  %v868_v24 = vmul.f32 %v1219_v51, %v866_v23 }
 0x581   : > { %v871_v25 = vmul.f32 %v1217_v8, %v869_v1  ;;  %v870_v27 = vadd.f32 0.2548296, %v868_v24 }
 0x583   : > { %v881_v28 = vmul.f32 %v1221_v26, %v871_v25  ;;  %v872_v29 = vmul.f32 %v1219_v51, %v870_v27 }
 0x585   : > { %v883_v31 = vsub.f32 1.0, %v881_v28  ;;  %v882_v32 = vmul.f32 %v1223_v30, %v872_v29 }
 0x587   : > { %v887_v33 = vsub.f32 0.0, %v883_v31  ;;  %v884_v34 = vsub.f32 1.0, %v882_v32 }
 0x589   : > { %v889_v35 = vsel %vm885_vm8, %v883_v31, %v887_v33  ;;  %v888_v36 = vsub.f32 0.0, %v884_v34 }
 0x58a   : > { %v891_v37 = vadd.f32 1.0, %v889_v35 }
 0x58b   : > { %v890_v38 = vsel %vm886_vm9, %v884_v34, %v888_v36 }
 0x58c   : > { %v892_v42 = vadd.f32 1.0, %v890_v38  ;;  %v893_v43 = vmul.f32 %v891_v37, %v841_v40 }
 0x58e   : > { %v894_v45 = vmul.f32 %v892_v42, %v842_v41 }
 0x590   : > { %v895_v47 = vpack.c.bf16 %v894_v45, %v893_v43 }
 0x592   : > { %1138 = vmatmul.mubr.msk.bf16.vlgmr.msra.gmra.mrb[0].mxu1 %vm935_vm10, %v895_v47 }
 0x665   : > { %v973_v52 = vpop.f32.mrb[0].mxu1 }
 0x666   : > { %v974_v53 = vadd.f32 %v1081_v49, %v973_v52  ;;  %v1139_v55 = vpop.f32.mrb[1].mxu1 }
 0x667   : > { %v976_v56 = vpop.f32.mrb[2].mxu1 }
 0x668   : > { %v980_v57 = vadd.f32 %v974_v53, %v1495_v12  ;;  %v977_v58 = vadd.f32 %v1081_v49, %v976_v56  ;;  %v1140_v59 = vpop.f32.mrb[3].mxu1 }
 0x66a   : > { %982 = vst.msk [vmem:[%s434_s16] sm:$0xff] %vm447_vm0, %v980_v57  ;;  %v981_v60 = vadd.f32 %v977_v58, %v1498_v15 }
 0x66c   : > { %983 = vst.msk [vmem:[%s434_s16 + $0x8] sm:$0xff] %vm447_vm0, %v981_v60 }
 0x66d   : > { %1237 = shalt.err (!%p1234_p3)
}
 0x66e   : > { %s1238_s23 = scalar_lea.hbm %s1549_s1, 256  ;;  %s1242_s22 = scalar_lea.hbm %s1610_s13, 512 }
 0x66f   : > { %p1239_p4 = scmp.ne.s32.totalorder %s1549_s1, %s1238_s23  ;;  %p1243_p9 = scmp.lt.u32.totalorder %s1549_s1, %s1610_s13 }
 0x670   : > { %p1244_p10 = scmp.lt.u32.totalorder %s1242_s22, %s1238_s23  ;;  %p1246_p12 = scmp.lt.u32.totalorder %s1238_s23, %s1549_s1 }
 0x671   : > { %p1240_p7 = pnand %p1239_p4, %p1402_p5 }
 0x672   : > { %p1245_p11 = por %p1244_p10, %p1243_p9 }
 0x673   : > { %p1241_p8 = pneg %p1240_p7 }
 0x674   : > { %p1247_p13 = por %p1246_p12, %p1245_p11 }
 0x676   : > { %p1248_p0 = pnand %p1247_p13, %p1241_p8 }
 0x678   : > { %1251 = shalt.err (!%p1248_p0)
}
 0x679   : > { %s1292_s24 = smov 128   ;;  %s1293_s15 = smov 8  }
 0x67a   : > { %1141 = dma.vmem_to_hbm [thread:$0]  (%p1402_p5), %s1551_s20, 256, %s1549_s1, %s1556_s29, %s1292_s24, %s1292_s24, %s1293_s15  }
 0x67b PF: > { %p1147_p1 = scmp.ge.s32.totalorder %s1286_s28, 2  ;;  %s1013_s16 = sand.u32 1, %s1274_s25  }
 0x67c   : > { %s1014_s23 = scalar_lea.sflag [#allocation3], %s1013_s16 }
 0x67d   : > { %p1144_p2 = pnand %p1147_p1, %p1406_p6 }
 0x67f   : > { %1269 = dma.done.wait (!%p1144_p2), %s1014_s23, 256  }
 0x680   : > { %1271 = vsyncadd (!%p1144_p2), %s1014_s23, 4294967040  ;;  %p23_p3 = scmp.ge.s32.totalorder %s1389_s14, 4   ;;  %s1617_s25 = smov %s1278_s26 }
 0x681   : > { %s1618_s26 = smov %s1282_s27  ;;  %s1619_s27 = smov %s1400_s17 }
 0x682   : > { %s1620_s28 = smov %s1389_s14  ;;  %25 = sbr.rel (!%p23_p3) target bundleno = 6 (0x6), region = 107 }
 0x689   :  { %1019 = vsyncpa [#allocation3], 1 }
 0x68a   :  { %1021 = vsyncpa [#allocation3 + $0x1], 1 }

</bundles_post_ra>
